<compile_context>
chip_gen: v5e
topology: v5e:2x2
jax: 0.10.0
libtpu: 0.0.40
codegen_flags: <defaults>
</compile_context>

<pallas_src>
import jax
import jax.numpy as jnp
from jax import lax
from jax.experimental import pallas as pl
from jax.experimental.pallas import tpu as pltpu


def _round_up(x: int, m: int) -> int:
    return ((x + m - 1) // m) * m


def _make_supcon_kernel(*, use_labels, assume_normalized, inv_temp, loss_scale,
                        m_real, n_real, n_pad, tm, tn):
    """Build the tiled SupCon kernel with static config baked in via closure."""

    def kernel(*refs):
        if use_labels:
            a_ref, c_ref, al_ref, cl_ref, out_ref = refs[:5]
            scratch = refs[5:]
            mask_ref = None
        else:
            a_ref, c_ref, mask_ref, out_ref = refs[:4]
            scratch = refs[4:]
            al_ref = cl_ref = None

        if assume_normalized:
            l_ref, sp_ref, cp_ref = scratch
            m_ref = None
        else:
            m_ref, l_ref, sp_ref, cp_ref = scratch

        i = pl.program_id(0)      # anchor-row tile   ("parallel")
        k = pl.program_id(1)      # contrast-col tile ("arbitrary" reduction)

        @pl.when(k == 0)
        def _init():
            if not assume_normalized:
                # Finite -inf surrogate keeps exp(m_prev - m_new) NaN-free.
                m_ref[...] = jnp.full_like(m_ref, -1e30)
            l_ref[...] = jnp.zeros_like(l_ref)
            sp_ref[...] = jnp.zeros_like(sp_ref)
            cp_ref[...] = jnp.zeros_like(cp_ref)

        # (TM, TN) similarity tile: plain (M,K)x(K,N) MXU matmul, f32 accum.
        sim = jnp.dot(a_ref[...], c_ref[...],
                      preferred_element_type=jnp.float32) * inv_temp

        def update(pos, sim_m):
            if assume_normalized:
                # Features are L2-normalized => sim <= inv_temp, fixed shift.
                p = jnp.exp(sim_m - inv_temp)
                l_ref[...] = l_ref[...] + jnp.sum(p, axis=1, keepdims=True)
            else:
                m_prev = m_ref[...]
                m_new = jnp.maximum(m_prev, jnp.max(sim_m, axis=1, keepdims=True))
                alpha = jnp.exp(m_prev - m_new)
                p = jnp.exp(sim_m - m_new)        # masked entries -> exp(-inf)=0
                l_ref[...] = alpha * l_ref[...] + jnp.sum(p, axis=1, keepdims=True)
                m_ref[...] = m_new
            # TODO(synk): if bundle dumps show XLU saturation on v6e/v7x, move
            # these three row-sums onto the MXU (matmul vs ones((tn,128))).
            sp_ref[...] = sp_ref[...] + jnp.sum(pos * sim, axis=1, keepdims=True)
            cp_ref[...] = cp_ref[...] + jnp.sum(pos, axis=1, keepdims=True)

        row0 = i * tm
        col0 = k * tn
        # Does this tile touch the self-similarity diagonal?
        on_diag = (row0 < col0 + tn) & (col0 < row0 + tm)
        if n_pad:
            # Padded contrast columns only exist in the last column tile.
            boundary = on_diag | (k == pl.num_programs(1) - 1)
        else:
            boundary = on_diag

        @pl.when(boundary)
        def _boundary():
            row_g = row0 + lax.broadcasted_iota(jnp.int32, (tm, tn), 0)
            col_g = col0 + lax.broadcasted_iota(jnp.int32, (tm, tn), 1)
            logits_mask = (row_g != col_g) & (col_g < n_real)
            if use_labels:
                pos = ((al_ref[...] == cl_ref[...]) & logits_mask).astype(jnp.float32)
            else:
                pos = jnp.where(logits_mask,
                                mask_ref[...].astype(jnp.float32),
                                jnp.float32(0.0))
            sim_m = jnp.where(logits_mask, sim, jnp.float32(-jnp.inf))
            update(pos, sim_m)

        @pl.when(jnp.logical_not(boundary))
        def _interior():
            # Interior tiles: no diagonal, no padded columns -> skip all the
            # iota/compare/select work (major VALU saving at small D).
            if use_labels:
                pos = (al_ref[...] == cl_ref[...]).astype(jnp.float32)
            else:
                pos = mask_ref[...].astype(jnp.float32)
            update(pos, sim)

        @pl.when(k == pl.num_programs(1) - 1)
        def _finalize():
            if assume_normalized:
                lse = inv_temp + jnp.log(l_ref[...])
            else:
                lse = m_ref[...] + jnp.log(l_ref[...])            # (TM, 1)
            cnt = cp_ref[...]
            guard = jnp.where(cnt < 1e-6, jnp.float32(1.0), cnt)
            # sum_pos(log_prob) = sum_pos(sim) - cnt * logsumexp(sim)
            mean_lpp = (sp_ref[...] - cnt * lse) * pl.reciprocal(guard)
            loss = loss_scale * mean_lpp                           # (TM, 1)
            rows = row0 + lax.broadcasted_iota(jnp.int32, (tm, 1), 0)
            loss = jnp.where(rows < m_real, loss, jnp.float32(0.0))
            partial = jnp.sum(loss, axis=0, keepdims=True)         # (1, 1)
            # Lane-dense store: broadcast the per-tile partial across 128 lanes.
            out_ref[...] = jnp.broadcast_to(partial.reshape(1, 1, 1), (1, 1, 128))

    return kernel


def supcon_loss(features, labels=None, mask=None, *, temperature=0.07,
                contrast_mode='all', base_temperature=0.07,
                mxu_dtype=None, block_m=256, block_n=1024,
                assume_normalized=False):
    """JAX/Pallas equivalent of SupConLoss.forward (returns the scalar loss).

    mxu_dtype=None defaults to bfloat16 MXU inputs (f32 accumulation); pass
    mxu_dtype=jnp.float32 for the exact-precision path.
    assume_normalized=True skips the online max (only safe when features are
    L2-normalized, the standard SupCon usage).
    """
    features = jnp.asarray(features)
    if features.ndim < 3:
        raise ValueError('`features` needs to be [bsz, n_views, ...], '
                         'at least 3 dimensions are required')
    if features.ndim > 3:
        features = features.reshape(features.shape[0], features.shape[1], -1)
    bsz, n_views, dim = features.shape

    # --- positives: labels fast path (mask rebuilt in-kernel) vs explicit mask.
    use_labels = False
    samp_labels = None
    class_mask = None
    if labels is not None and mask is not None:
        raise ValueError('Cannot define both `labels` and `mask`')
    elif labels is None and mask is None:
        use_labels = True
        samp_labels = jnp.arange(bsz, dtype=jnp.int32)       # SimCLR: eye mask
    elif labels is not None:
        labels = jnp.asarray(labels).reshape(-1)
        if labels.shape[0] != bsz:
            raise ValueError('Num of labels does not match num of features')
        if jnp.issubdtype(labels.dtype, jnp.integer):
            use_labels = True
            samp_labels = labels.astype(jnp.int32)
        else:
            class_mask = (labels[:, None] == labels[None, :])
    else:
        class_mask = jnp.asarray(mask)

    contrast_count = n_views
    # contrast_feature = cat(unbind(features, dim=1), dim=0) -> view-major [N, D]
    contrast_feature = jnp.transpose(features, (1, 0, 2)).reshape(
        contrast_count * bsz, dim)
    if contrast_mode == 'one':
        anchor_feature = features[:, 0, :]
        anchor_count = 1
    elif contrast_mode == 'all':
        anchor_feature = contrast_feature
        anchor_count = contrast_count
    else:
        raise ValueError('Unknown mode: {}'.format(contrast_mode))

    M = anchor_count * bsz
    N = contrast_count * bsz

    # --- MXU input dtype (post-matmul softmax math always stays f32).
    if mxu_dtype is None:
        mxu_dtype = jnp.bfloat16          # f32 MXU is emulated & 2x the bytes
    mxu_dtype = jnp.dtype(mxu_dtype)
    feat_bytes = mxu_dtype.itemsize

    # --- tiling. Row granularity 16 (bf16 sublane packing); 32 when an int8
    # mask block is streamed (int8 native tiling).
    gran_m = 16 if use_labels else 32
    tm = min(_round_up(block_m, gran_m), _round_up(M, gran_m))
    tn = min(_round_up(block_n, 128), _round_up(N, 128))
    dp = _round_up(dim, 128)

    # --- generation-aware VMEM budget (v7x: 64 MiB physical / 32 MiB scoped).
    VMEM_TILE_BUDGET = 24 * 1024 * 1024

    def vmem_estimate(tm_, tn_):
        fp = 2 * (tm_ * dp + dp * tn_) * feat_bytes           # dbl-buffered feats
        fp += (2 * (tm_ + tn_) * 4) if use_labels else (2 * tm_ * tn_)  # labels / i8 mask
        fp += 5 * tm_ * 4                                     # scratch columns
        fp += 6 * tm_ * tn_ * 4                                # f32 temporaries (est.)
        fp += 2 * 128 * 4                                      # output block
        return fp

    # TODO(synk): for very large embedding dims, add a third grid axis over dp
    # (D-tiling with a (tm,tn) sim accumulator) instead of only shrinking tiles.
    while vmem_estimate(tm, tn) > VMEM_TILE_BUDGET and (tn > 128 or tm > gran_m):
        if tn > 128:
            tn = max(128, _round_up(tn // 2, 128))
        else:
            tm = max(gran_m, _round_up(tm // 2, gran_m))

    mp = _round_up(M, tm)
    np_ = _round_up(N, tn)

    # v7x has 2 TensorCores: make sure the "parallel" row axis has >= 2 tiles
    # when the problem is big enough to split.
    if mp // tm == 1:
        half = _round_up(max((M + 1) // 2, 1), gran_m)
        if gran_m <= half < tm:
            tm = half
            mp = _round_up(M, tm)

    grid = (mp // tm, np_ // tn)
    n_pad = np_ > N

    def pad2d(x, rows, cols, value=0):
        return jnp.pad(x, ((0, rows - x.shape[0]), (0, cols - x.shape[1])),
                       constant_values=value)

    anchor_p = pad2d(anchor_feature.astype(mxu_dtype), mp, dp)
    # Pre-transposed contrast (D, N): plain (M,K)x(K,N) MXU matmul in-kernel.
    contrast_t = jnp.transpose(pad2d(contrast_feature.astype(mxu_dtype), np_, dp))

    common_specs = [
        pl.BlockSpec((tm, dp), lambda i, k: (i, 0)),   # anchor rows
        pl.BlockSpec((dp, tn), lambda i, k: (0, k)),   # contrast cols (pre-T)
    ]

    if use_labels:
        a_lbl = jnp.pad(jnp.tile(samp_labels, anchor_count), (0, mp - M),
                        constant_values=-1).reshape(mp, 1)
        c_lbl = jnp.pad(jnp.tile(samp_labels, contrast_count), (0, np_ - N),
                        constant_values=-1).reshape(1, np_)
        in_specs = common_specs + [
            pl.BlockSpec((tm, 1), lambda i, k: (i, 0)),
            pl.BlockSpec((1, tn), lambda i, k: (0, k)),
        ]
        operands = (anchor_p, contrast_t, a_lbl, c_lbl)
    else:
        # TODO(synk): weighted (non-binary) explicit masks are thresholded here;
        # add an f32-mask variant if weighted masks are ever required.
        mask_i8 = (class_mask != 0).astype(jnp.int8)            # (bsz, bsz)
        if bsz % tm == 0 and bsz % tn == 0:
            # No padding needed and the (bsz,bsz) mask can be indexed modularly
            # instead of materializing the O(M*N) tiled copy.
            nb_m, nb_n = bsz // tm, bsz // tn
            mask_in = mask_i8
            mask_spec = pl.BlockSpec((tm, tn),
                                     lambda i, k: (i % nb_m, k % nb_n))
        else:
            mask_in = pad2d(jnp.tile(mask_i8, (anchor_count, contrast_count)),
                            mp, np_)
            mask_spec = pl.BlockSpec((tm, tn), lambda i, k: (i, k))
        in_specs = common_specs + [mask_spec]
        operands = (anchor_p, contrast_t, mask_in)

    kernel = _make_supcon_kernel(
        use_labels=use_labels,
        assume_normalized=bool(assume_normalized),
        inv_temp=float(1.0 / temperature),
        loss_scale=float(-(temperature / base_temperature)),
        m_real=M, n_real=N, n_pad=n_pad, tm=tm, tn=tn)

    n_scratch = 3 if assume_normalized else 4
    scratch_shapes = [pltpu.VMEM((tm, 1), jnp.float32) for _ in range(n_scratch)]

    est_bytes = vmem_estimate(tm, tn)
    vmem_limit = int(min(48 * 1024 * 1024,
                         max(32 * 1024 * 1024, int(1.25 * est_bytes) + (2 << 20))))

    in_bytes = sum(int(x.size) * jnp.dtype(x.dtype).itemsize for x in operands)
    cost = pl.CostEstimate(flops=2 * mp * np_ * dp,
                           transcendentals=mp * np_,
                           bytes_accessed=grid[0] * in_bytes + grid[0] * 128 * 4)

    # TODO(synk): forward-only; add a custom VJP / backward kernel if gradients
    # through this loss are required (pallas_call has no autodiff rule here).
    partials = pl.pallas_call(
        kernel,
        out_shape=jax.ShapeDtypeStruct((grid[0], 1, 128), jnp.float32),
        grid_spec=pltpu.PrefetchScalarGridSpec(
            num_scalar_prefetch=0,
            grid=grid,
            in_specs=in_specs,
            out_specs=pl.BlockSpec((1, 1, 128), lambda i, k: (i, 0, 0)),
            scratch_shapes=scratch_shapes,
        ),
        compiler_params=pltpu.CompilerParams(
            dimension_semantics=("parallel", "arbitrary"),
            vmem_limit_bytes=vmem_limit),
        cost_estimate=cost,
    )(*operands)

    # loss.view(anchor_count, batch_size).mean() == sum over all anchors / M
    return jnp.sum(partials[:, 0, 0]) / M


def _supcon_loss_ref(features, labels=None, mask=None, *, temperature=0.07,
                     contrast_mode='all', base_temperature=0.07):
    """Pure-JAX reference (direct transcription of the PyTorch module)."""
    bsz, n_views, _ = features.shape
    if labels is None and mask is None:
        mask = jnp.eye(bsz, dtype=jnp.float32)
    elif labels is not None:
        labels = labels.reshape(-1, 1)
        mask = (labels == labels.T).astype(jnp.float32)
    else:
        mask = mask.astype(jnp.float32)
    cf = jnp.concatenate([features[:, v, :] for v in range(n_views)], 0)
    contrast_count = n_views
    if contrast_mode == 'one':
        af = features[:, 0, :]
        anchor_count = 1
    else:
        af = cf
        anchor_count = contrast_count
    sim = (af @ cf.T) / temperature
    logits = sim - jnp.max(sim, axis=1, keepdims=True)
    mask = jnp.tile(mask, (anchor_count, contrast_count))
    M = anchor_count * bsz
    N = contrast_count * bsz
    rows = jnp.arange(M)[:, None]
    cols = jnp.arange(N)[None, :]
    logits_mask = (rows != cols).astype(jnp.float32)
    mask = mask * logits_mask
    exp_logits = jnp.exp(logits) * logits_mask
    log_prob = logits - jnp.log(jnp.sum(exp_logits, 1, keepdims=True))
    pos = jnp.sum(mask, 1)
    pos = jnp.where(pos < 1e-6, 1.0, pos)
    mlpp = jnp.sum(mask * log_prob, 1) / pos
    return jnp.mean(-(temperature / base_temperature) * mlpp)


if __name__ == "__main__":
    key = jax.random.PRNGKey(0)
    bsz, n_views, dim = 8, 2, 32
    kf, kl = jax.random.split(key)
    feats = jax.random.normal(kf, (bsz, n_views, dim), dtype=jnp.float32)
    # L2-normalize features (standard SupCon usage).
    feats = feats / jnp.linalg.norm(feats, axis=-1, keepdims=True)
    labels = jax.random.randint(kl, (bsz,), 0, 3)
    user_mask = (labels.reshape(-1, 1) == labels.reshape(1, -1)).astype(jnp.float32)

    ref_sup = _supcon_loss_ref(feats, labels=labels)
    ref_simclr = _supcon_loss_ref(feats)
    ref_one = _supcon_loss_ref(feats, labels=labels, contrast_mode='one')

    f32 = jnp.float32
    # Exact path (f32 MXU opt-out): supervised, SimCLR, explicit mask, 'one',
    # and the assume_normalized (no online max) variant.
    loss_sup = jax.block_until_ready(supcon_loss(feats, labels=labels, mxu_dtype=f32))
    loss_simclr = jax.block_until_ready(supcon_loss(feats, mxu_dtype=f32))
    loss_mask = jax.block_until_ready(supcon_loss(feats, mask=user_mask, mxu_dtype=f32))
    loss_one = jax.block_until_ready(
        supcon_loss(feats, labels=labels, contrast_mode='one', mxu_dtype=f32))
    loss_norm = jax.block_until_ready(
        supcon_loss(feats, labels=labels, mxu_dtype=f32, assume_normalized=True))
    # Default path: bf16 MXU inputs, f32 accumulation (looser tolerance).
    loss_bf16 = jax.block_until_ready(supcon_loss(feats, labels=labels))

    assert jnp.allclose(loss_sup, ref_sup, atol=1e-3, rtol=1e-3), (loss_sup, ref_sup)
    assert jnp.allclose(loss_simclr, ref_simclr, atol=1e-3, rtol=1e-3), (
        loss_simclr, ref_simclr)
    assert jnp.allclose(loss_mask, ref_sup, atol=1e-3, rtol=1e-3), (loss_mask, ref_sup)
    assert jnp.allclose(loss_one, ref_one, atol=1e-3, rtol=1e-3), (loss_one, ref_one)
    assert jnp.allclose(loss_norm, ref_sup, atol=1e-3, rtol=1e-3), (loss_norm, ref_sup)
    assert jnp.allclose(loss_bf16, ref_sup, atol=2.5e-1, rtol=1e-1), (
        loss_bf16, ref_sup)

    print("KERNEL_OK")
</pallas_src>

<mosaic_0001>
module attributes {stable_mosaic.version = 11 : i64} {
  func.func @kernel(%arg0: i32, %arg1: i32, %arg2: memref<16x128xf32, #tpu.memory_space<vmem>>, %arg3: memref<128x128xf32, #tpu.memory_space<vmem>>, %arg4: memref<16x1xi32, #tpu.memory_space<vmem>>, %arg5: memref<1x128xi32, #tpu.memory_space<vmem>>, %arg6: memref<1x1x128xf32, #tpu.memory_space<vmem>>, %arg7: memref<16x1xf32, #tpu.memory_space<vmem>>, %arg8: memref<16x1xf32, #tpu.memory_space<vmem>>, %arg9: memref<16x1xf32, #tpu.memory_space<vmem>>, %arg10: memref<16x1xf32, #tpu.memory_space<vmem>>) attributes {dimension_semantics = [#tpu.dimension_semantics<parallel>, #tpu.dimension_semantics<arbitrary>], iteration_bounds = array<i64: 1, 1>, scalar_prefetch = 0 : i64, scratch_operands = 4 : i64, tpu.core_type = #tpu.core_type<tc>, window_params = [{transform_indices = @transform_0, window_bounds = array<i64: 16, 128>}, {transform_indices = @transform_1, window_bounds = array<i64: 128, 128>}, {transform_indices = @transform_2, window_bounds = array<i64: 16, 1>}, {transform_indices = @transform_3, window_bounds = array<i64: 1, 128>}, {transform_indices = @transform_4, window_bounds = array<i64: 1, 1, 128>}]} {
    %c0_i32 = arith.constant 0 : i32
    %0 = arith.cmpi eq, %arg1, %c0_i32 : i32
    %1 = arith.extui %0 : i1 to i32
    %c0_i32_0 = arith.constant 0 : i32
    %2 = arith.cmpi ne, %1, %c0_i32_0 : i32
    scf.if %2 {
      %cst_12 = arith.constant -1.000000e+30 : f32
      %25 = vector.broadcast %cst_12 : f32 to vector<16x1xf32>
      %c0_13 = arith.constant 0 : index
      %c0_14 = arith.constant 0 : index
      %26 = vector.load %arg7[%c0_13, %c0_14] : memref<16x1xf32, #tpu.memory_space<vmem>>, vector<16x1xf32>
      tpu.vector_store %arg7[%c0_13, %c0_14], %25 {strides = array<i32>} : memref<16x1xf32, #tpu.memory_space<vmem>>, vector<16x1xf32>,
      %cst_15 = arith.constant 0.000000e+00 : f32
      %27 = vector.broadcast %cst_15 : f32 to vector<16x1xf32>
      %c0_16 = arith.constant 0 : index
      %c0_17 = arith.constant 0 : index
      %28 = vector.load %arg8[%c0_16, %c0_17] : memref<16x1xf32, #tpu.memory_space<vmem>>, vector<16x1xf32>
      tpu.vector_store %arg8[%c0_16, %c0_17], %27 {strides = array<i32>} : memref<16x1xf32, #tpu.memory_space<vmem>>, vector<16x1xf32>,
      %cst_18 = arith.constant 0.000000e+00 : f32
      %29 = vector.broadcast %cst_18 : f32 to vector<16x1xf32>
      %c0_19 = arith.constant 0 : index
      %c0_20 = arith.constant 0 : index
      %30 = vector.load %arg9[%c0_19, %c0_20] : memref<16x1xf32, #tpu.memory_space<vmem>>, vector<16x1xf32>
      tpu.vector_store %arg9[%c0_19, %c0_20], %29 {strides = array<i32>} : memref<16x1xf32, #tpu.memory_space<vmem>>, vector<16x1xf32>,
      %cst_21 = arith.constant 0.000000e+00 : f32
      %31 = vector.broadcast %cst_21 : f32 to vector<16x1xf32>
      %c0_22 = arith.constant 0 : index
      %c0_23 = arith.constant 0 : index
      %32 = vector.load %arg10[%c0_22, %c0_23] : memref<16x1xf32, #tpu.memory_space<vmem>>, vector<16x1xf32>
      tpu.vector_store %arg10[%c0_22, %c0_23], %31 {strides = array<i32>} : memref<16x1xf32, #tpu.memory_space<vmem>>, vector<16x1xf32>,
    } else {
    }
    %c0 = arith.constant 0 : index
    %c0_1 = arith.constant 0 : index
    %3 = vector.load %arg2[%c0, %c0_1] : memref<16x128xf32, #tpu.memory_space<vmem>>, vector<16x128xf32>
    %c0_2 = arith.constant 0 : index
    %c0_3 = arith.constant 0 : index
    %4 = vector.load %arg3[%c0_2, %c0_3] : memref<128x128xf32, #tpu.memory_space<vmem>>, vector<128x128xf32>
    %cst = arith.constant dense<0.000000e+00> : vector<16x128xf32>
    %5 = tpu.matmul %3, %4, %cst {dimension_numbers = #tpu.dot_dimension_numbers<[1], [0], [0], [1], [0, 0, 1, 1], [], []>} : vector<16x128xf32>, vector<128x128xf32>, vector<16x128xf32> -> vector<16x128xf32>
    %cst_4 = arith.constant 14.2857141 : f32
    %6 = vector.broadcast %cst_4 : f32 to vector<16x128xf32>
    %7 = arith.mulf %5, %6 : vector<16x128xf32>
    %c16_i32 = arith.constant 16 : i32
    %8 = arith.muli %arg0, %c16_i32 : i32
    %c128_i32 = arith.constant 128 : i32
    %9 = arith.muli %arg1, %c128_i32 : i32
    %c128_i32_5 = arith.constant 128 : i32
    %10 = arith.addi %9, %c128_i32_5 : i32
    %11 = arith.cmpi slt, %8, %10 : i32
    %c16_i32_6 = arith.constant 16 : i32
    %12 = arith.addi %8, %c16_i32_6 : i32
    %13 = arith.cmpi slt, %9, %12 : i32
    %14 = arith.andi %11, %13 : i1
    %c0_i32_7 = arith.constant 0 : i32
    %15 = arith.cmpi eq, %arg1, %c0_i32_7 : i32
    %16 = arith.ori %14, %15 : i1
    %17 = arith.extui %16 : i1 to i32
    %c0_i32_8 = arith.constant 0 : i32
    %18 = arith.cmpi ne, %17, %c0_i32_8 : i32
    scf.if %18 {
      %25 = tpu.iota {dimensions = array<i32: 0>} : vector<16x128xi32>
      %26 = vector.broadcast %8 : i32 to vector<16x128xi32>
      %27 = arith.addi %26, %25 : vector<16x128xi32>
      %28 = tpu.iota {dimensions = array<i32: 1>} : vector<16x128xi32>
      %29 = vector.broadcast %9 : i32 to vector<16x128xi32>
      %30 = arith.addi %29, %28 : vector<16x128xi32>
      %31 = arith.cmpi ne, %27, %30 : vector<16x128xi32>
      %c16_i32_12 = arith.constant 16 : i32
      %32 = vector.broadcast %c16_i32_12 : i32 to vector<16x128xi32>
      %33 = arith.cmpi slt, %30, %32 : vector<16x128xi32>
      %34 = arith.andi %31, %33 : vector<16x128xi1>
      %c0_13 = arith.constant 0 : index
      %c0_14 = arith.constant 0 : index
      %35 = vector.load %arg4[%c0_13, %c0_14] : memref<16x1xi32, #tpu.memory_space<vmem>>, vector<16x1xi32>
      %c0_15 = arith.constant 0 : index
      %c0_16 = arith.constant 0 : index
      %36 = vector.load %arg5[%c0_15, %c0_16] : memref<1x128xi32, #tpu.memory_space<vmem>>, vector<1x128xi32>
      %37 = vector.broadcast %35 : vector<16x1xi32> to vector<16x128xi32>
      %38 = vector.broadcast %36 : vector<1x128xi32> to vector<16x128xi32>
      %39 = arith.cmpi eq, %37, %38 : vector<16x128xi32>
      %40 = arith.andi %39, %34 : vector<16x128xi1>
      %41 = arith.extui %40 : vector<16x128xi1> to vector<16x128xi32>
      %42 = arith.sitofp %41 : vector<16x128xi32> to vector<16x128xf32>
      %cst_17 = arith.constant 0xFF800000 : f32
      %43 = vector.broadcast %cst_17 : f32 to vector<16x128xf32>
      %44 = arith.select %34, %7, %43 : vector<16x128xi1>, vector<16x128xf32>
      %c0_18 = arith.constant 0 : index
      %c0_19 = arith.constant 0 : index
      %45 = vector.load %arg7[%c0_18, %c0_19] : memref<16x1xf32, #tpu.memory_space<vmem>>, vector<16x1xf32>
      %cst_20 = arith.constant dense<0xFF800000> : vector<16xf32>
      %46 = vector.multi_reduction <maximumf>, %44, %cst_20 [1] : vector<16x128xf32> to vector<16xf32>
      %47 = vector.shape_cast %46 : vector<16xf32> to vector<16x1xf32>
      %48 = arith.maximumf %45, %47 : vector<16x1xf32>
      %49 = arith.subf %45, %48 : vector<16x1xf32>
      %50 = math.exp %49 : vector<16x1xf32>
      %51 = vector.broadcast %48 : vector<16x1xf32> to vector<16x128xf32>
      %52 = arith.subf %44, %51 : vector<16x128xf32>
      %53 = math.exp %52 : vector<16x128xf32>
      %c0_21 = arith.constant 0 : index
      %c0_22 = arith.constant 0 : index
      %54 = vector.load %arg8[%c0_21, %c0_22] : memref<16x1xf32, #tpu.memory_space<vmem>>, vector<16x1xf32>
      %55 = arith.mulf %50, %54 : vector<16x1xf32>
      %cst_23 = arith.constant dense<0.000000e+00> : vector<16xf32>
      %56 = vector.multi_reduction <add>, %53, %cst_23 [1] : vector<16x128xf32> to vector<16xf32>
      %57 = vector.shape_cast %56 : vector<16xf32> to vector<16x1xf32>
      %58 = arith.addf %55, %57 : vector<16x1xf32>
      %c0_24 = arith.constant 0 : index
      %c0_25 = arith.constant 0 : index
      %59 = vector.load %arg8[%c0_24, %c0_25] : memref<16x1xf32, #tpu.memory_space<vmem>>, vector<16x1xf32>
      tpu.vector_store %arg8[%c0_24, %c0_25], %58 {strides = array<i32>} : memref<16x1xf32, #tpu.memory_space<vmem>>, vector<16x1xf32>,
      %c0_26 = arith.constant 0 : index
      %c0_27 = arith.constant 0 : index
      %60 = vector.load %arg7[%c0_26, %c0_27] : memref<16x1xf32, #tpu.memory_space<vmem>>, vector<16x1xf32>
      tpu.vector_store %arg7[%c0_26, %c0_27], %48 {strides = array<i32>} : memref<16x1xf32, #tpu.memory_space<vmem>>, vector<16x1xf32>,
      %c0_28 = arith.constant 0 : index
      %c0_29 = arith.constant 0 : index
      %61 = vector.load %arg9[%c0_28, %c0_29] : memref<16x1xf32, #tpu.memory_space<vmem>>, vector<16x1xf32>
      %62 = arith.mulf %42, %7 : vector<16x128xf32>
      %cst_30 = arith.constant dense<0.000000e+00> : vector<16xf32>
      %63 = vector.multi_reduction <add>, %62, %cst_30 [1] : vector<16x128xf32> to vector<16xf32>
      %64 = vector.shape_cast %63 : vector<16xf32> to vector<16x1xf32>
      %65 = arith.addf %61, %64 : vector<16x1xf32>
      %c0_31 = arith.constant 0 : index
      %c0_32 = arith.constant 0 : index
      %66 = vector.load %arg9[%c0_31, %c0_32] : memref<16x1xf32, #tpu.memory_space<vmem>>, vector<16x1xf32>
      tpu.vector_store %arg9[%c0_31, %c0_32], %65 {strides = array<i32>} : memref<16x1xf32, #tpu.memory_space<vmem>>, vector<16x1xf32>,
      %c0_33 = arith.constant 0 : index
      %c0_34 = arith.constant 0 : index
      %67 = vector.load %arg10[%c0_33, %c0_34] : memref<16x1xf32, #tpu.memory_space<vmem>>, vector<16x1xf32>
      %cst_35 = arith.constant dense<0.000000e+00> : vector<16xf32>
      %68 = vector.multi_reduction <add>, %42, %cst_35 [1] : vector<16x128xf32> to vector<16xf32>
      %69 = vector.shape_cast %68 : vector<16xf32> to vector<16x1xf32>
      %70 = arith.addf %67, %69 : vector<16x1xf32>
      %c0_36 = arith.constant 0 : index
      %c0_37 = arith.constant 0 : index
      %71 = vector.load %arg10[%c0_36, %c0_37] : memref<16x1xf32, #tpu.memory_space<vmem>>, vector<16x1xf32>
      tpu.vector_store %arg10[%c0_36, %c0_37], %70 {strides = array<i32>} : memref<16x1xf32, #tpu.memory_space<vmem>>, vector<16x1xf32>,
    } else {
    }
    %true = arith.constant true
    %19 = arith.xori %16, %true : i1
    %20 = arith.extui %19 : i1 to i32
    %c0_i32_9 = arith.constant 0 : i32
    %21 = arith.cmpi ne, %20, %c0_i32_9 : i32
    scf.if %21 {
      %c0_12 = arith.constant 0 : index
      %c0_13 = arith.constant 0 : index
      %25 = vector.load %arg4[%c0_12, %c0_13] : memref<16x1xi32, #tpu.memory_space<vmem>>, vector<16x1xi32>
      %c0_14 = arith.constant 0 : index
      %c0_15 = arith.constant 0 : index
      %26 = vector.load %arg5[%c0_14, %c0_15] : memref<1x128xi32, #tpu.memory_space<vmem>>, vector<1x128xi32>
      %27 = vector.broadcast %25 : vector<16x1xi32> to vector<16x128xi32>
      %28 = vector.broadcast %26 : vector<1x128xi32> to vector<16x128xi32>
      %29 = arith.cmpi eq, %27, %28 : vector<16x128xi32>
      %30 = arith.extui %29 : vector<16x128xi1> to vector<16x128xi32>
      %31 = arith.sitofp %30 : vector<16x128xi32> to vector<16x128xf32>
      %c0_16 = arith.constant 0 : index
      %c0_17 = arith.constant 0 : index
      %32 = vector.load %arg7[%c0_16, %c0_17] : memref<16x1xf32, #tpu.memory_space<vmem>>, vector<16x1xf32>
      %cst_18 = arith.constant dense<0xFF800000> : vector<16xf32>
      %33 = vector.multi_reduction <maximumf>, %7, %cst_18 [1] : vector<16x128xf32> to vector<16xf32>
      %34 = vector.shape_cast %33 : vector<16xf32> to vector<16x1xf32>
      %35 = arith.maximumf %32, %34 : vector<16x1xf32>
      %36 = arith.subf %32, %35 : vector<16x1xf32>
      %37 = math.exp %36 : vector<16x1xf32>
      %38 = vector.broadcast %35 : vector<16x1xf32> to vector<16x128xf32>
      %39 = arith.subf %7, %38 : vector<16x128xf32>
      %40 = math.exp %39 : vector<16x128xf32>
      %c0_19 = arith.constant 0 : index
      %c0_20 = arith.constant 0 : index
      %41 = vector.load %arg8[%c0_19, %c0_20] : memref<16x1xf32, #tpu.memory_space<vmem>>, vector<16x1xf32>
      %42 = arith.mulf %37, %41 : vector<16x1xf32>
      %cst_21 = arith.constant dense<0.000000e+00> : vector<16xf32>
      %43 = vector.multi_reduction <add>, %40, %cst_21 [1] : vector<16x128xf32> to vector<16xf32>
      %44 = vector.shape_cast %43 : vector<16xf32> to vector<16x1xf32>
      %45 = arith.addf %42, %44 : vector<16x1xf32>
      %c0_22 = arith.constant 0 : index
      %c0_23 = arith.constant 0 : index
      %46 = vector.load %arg8[%c0_22, %c0_23] : memref<16x1xf32, #tpu.memory_space<vmem>>, vector<16x1xf32>
      tpu.vector_store %arg8[%c0_22, %c0_23], %45 {strides = array<i32>} : memref<16x1xf32, #tpu.memory_space<vmem>>, vector<16x1xf32>,
      %c0_24 = arith.constant 0 : index
      %c0_25 = arith.constant 0 : index
      %47 = vector.load %arg7[%c0_24, %c0_25] : memref<16x1xf32, #tpu.memory_space<vmem>>, vector<16x1xf32>
      tpu.vector_store %arg7[%c0_24, %c0_25], %35 {strides = array<i32>} : memref<16x1xf32, #tpu.memory_space<vmem>>, vector<16x1xf32>,
      %c0_26 = arith.constant 0 : index
      %c0_27 = arith.constant 0 : index
      %48 = vector.load %arg9[%c0_26, %c0_27] : memref<16x1xf32, #tpu.memory_space<vmem>>, vector<16x1xf32>
      %49 = arith.mulf %31, %7 : vector<16x128xf32>
      %cst_28 = arith.constant dense<0.000000e+00> : vector<16xf32>
      %50 = vector.multi_reduction <add>, %49, %cst_28 [1] : vector<16x128xf32> to vector<16xf32>
      %51 = vector.shape_cast %50 : vector<16xf32> to vector<16x1xf32>
      %52 = arith.addf %48, %51 : vector<16x1xf32>
      %c0_29 = arith.constant 0 : index
      %c0_30 = arith.constant 0 : index
      %53 = vector.load %arg9[%c0_29, %c0_30] : memref<16x1xf32, #tpu.memory_space<vmem>>, vector<16x1xf32>
      tpu.vector_store %arg9[%c0_29, %c0_30], %52 {strides = array<i32>} : memref<16x1xf32, #tpu.memory_space<vmem>>, vector<16x1xf32>,
      %c0_31 = arith.constant 0 : index
      %c0_32 = arith.constant 0 : index
      %54 = vector.load %arg10[%c0_31, %c0_32] : memref<16x1xf32, #tpu.memory_space<vmem>>, vector<16x1xf32>
      %cst_33 = arith.constant dense<0.000000e+00> : vector<16xf32>
      %55 = vector.multi_reduction <add>, %31, %cst_33 [1] : vector<16x128xf32> to vector<16xf32>
      %56 = vector.shape_cast %55 : vector<16xf32> to vector<16x1xf32>
      %57 = arith.addf %54, %56 : vector<16x1xf32>
      %c0_34 = arith.constant 0 : index
      %c0_35 = arith.constant 0 : index
      %58 = vector.load %arg10[%c0_34, %c0_35] : memref<16x1xf32, #tpu.memory_space<vmem>>, vector<16x1xf32>
      tpu.vector_store %arg10[%c0_34, %c0_35], %57 {strides = array<i32>} : memref<16x1xf32, #tpu.memory_space<vmem>>, vector<16x1xf32>,
    } else {
    }
    %c0_i32_10 = arith.constant 0 : i32
    %22 = arith.cmpi eq, %arg1, %c0_i32_10 : i32
    %23 = arith.extui %22 : i1 to i32
    %c0_i32_11 = arith.constant 0 : i32
    %24 = arith.cmpi ne, %23, %c0_i32_11 : i32
    scf.if %24 {
      %c0_12 = arith.constant 0 : index
      %c0_13 = arith.constant 0 : index
      %25 = vector.load %arg7[%c0_12, %c0_13] : memref<16x1xf32, #tpu.memory_space<vmem>>, vector<16x1xf32>
      %c0_14 = arith.constant 0 : index
      %c0_15 = arith.constant 0 : index
      %26 = vector.load %arg8[%c0_14, %c0_15] : memref<16x1xf32, #tpu.memory_space<vmem>>, vector<16x1xf32>
      %27 = math.log %26 : vector<16x1xf32>
      %28 = arith.addf %25, %27 : vector<16x1xf32>
      %c0_16 = arith.constant 0 : index
      %c0_17 = arith.constant 0 : index
      %29 = vector.load %arg10[%c0_16, %c0_17] : memref<16x1xf32, #tpu.memory_space<vmem>>, vector<16x1xf32>
      %cst_18 = arith.constant 9.99999997E-7 : f32
      %30 = vector.broadcast %cst_18 : f32 to vector<16x1xf32>
      %31 = arith.cmpf olt, %29, %30 : vector<16x1xf32>
      %cst_19 = arith.constant 1.000000e+00 : f32
      %32 = vector.broadcast %cst_19 : f32 to vector<16x1xf32>
      %33 = arith.select %31, %32, %29 : vector<16x1xi1>, vector<16x1xf32>
      %c0_20 = arith.constant 0 : index
      %c0_21 = arith.constant 0 : index
      %34 = vector.load %arg9[%c0_20, %c0_21] : memref<16x1xf32, #tpu.memory_space<vmem>>, vector<16x1xf32>
      %35 = arith.mulf %29, %28 : vector<16x1xf32>
      %36 = arith.subf %34, %35 : vector<16x1xf32>
      %37 = tpu.reciprocal %33 : vector<16x1xf32> -> vector<16x1xf32>
      %38 = arith.mulf %36, %37 : vector<16x1xf32>
      %cst_22 = arith.constant -1.000000e+00 : f32
      %39 = vector.broadcast %cst_22 : f32 to vector<16x1xf32>
      %40 = arith.mulf %39, %38 : vector<16x1xf32>
      %41 = tpu.iota {dimensions = array<i32: 0>} : vector<16x1xi32>
      %42 = vector.broadcast %8 : i32 to vector<16x1xi32>
      %43 = arith.addi %42, %41 : vector<16x1xi32>
      %c16_i32_23 = arith.constant 16 : i32
      %44 = vector.broadcast %c16_i32_23 : i32 to vector<16x1xi32>
      %45 = arith.cmpi slt, %43, %44 : vector<16x1xi32>
      %cst_24 = arith.constant 0.000000e+00 : f32
      %46 = vector.broadcast %cst_24 : f32 to vector<16x1xf32>
      %47 = arith.select %45, %40, %46 : vector<16x1xi1>, vector<16x1xf32>
      %cst_25 = arith.constant dense<0.000000e+00> : vector<1xf32>
      %48 = vector.multi_reduction <add>, %47, %cst_25 [0] : vector<16x1xf32> to vector<1xf32>
      %49 = vector.shape_cast %48 : vector<1xf32> to vector<1x1xf32>
      %50 = vector.shape_cast %49 : vector<1x1xf32> to vector<1x1x1xf32>
      %51 = vector.shape_cast %50 : vector<1x1x1xf32> to vector<1x1x1xf32>
      %52 = vector.broadcast %51 : vector<1x1x1xf32> to vector<1x1x128xf32>
      %c0_26 = arith.constant 0 : index
      %c0_27 = arith.constant 0 : index
      %c0_28 = arith.constant 0 : index
      %53 = vector.load %arg6[%c0_26, %c0_27, %c0_28] : memref<1x1x128xf32, #tpu.memory_space<vmem>>, vector<1x1x128xf32>
      tpu.vector_store %arg6[%c0_26, %c0_27, %c0_28], %52 {strides = array<i32>} : memref<1x1x128xf32, #tpu.memory_space<vmem>>, vector<1x1x128xf32>,
    } else {
    }
    return
  }
  func.func @transform_0(%arg0: i32, %arg1: i32) -> (i32, i32) {
    %c0_i32 = arith.constant 0 : i32
    %c0_i32_0 = arith.constant 0 : i32
    return %arg0, %c0_i32 : i32, i32
  }
  func.func @transform_1(%arg0: i32, %arg1: i32) -> (i32, i32) {
    %c0_i32 = arith.constant 0 : i32
    %c0_i32_0 = arith.constant 0 : i32
    return %c0_i32, %arg1 : i32, i32
  }
  func.func @transform_2(%arg0: i32, %arg1: i32) -> (i32, i32) {
    %c0_i32 = arith.constant 0 : i32
    %c0_i32_0 = arith.constant 0 : i32
    return %arg0, %c0_i32 : i32, i32
  }
  func.func @transform_3(%arg0: i32, %arg1: i32) -> (i32, i32) {
    %c0_i32 = arith.constant 0 : i32
    %c0_i32_0 = arith.constant 0 : i32
    return %c0_i32, %arg1 : i32, i32
  }
  func.func @transform_4(%arg0: i32, %arg1: i32) -> (i32, i32, i32) {
    %c0_i32 = arith.constant 0 : i32
    %c0_i32_0 = arith.constant 0 : i32
    %c0_i32_1 = arith.constant 0 : i32
    return %arg0, %c0_i32, %c0_i32_0 : i32, i32, i32
  }
}

</mosaic_0001>

<bundles_post_ra>
// kernel: tpu_custom_call.1
= control target key start
LH: loop header
LB: loop body
LE: loop exit
PB: predicated region body
PF: predicated region fallthrough
CT: control target
= control target key end

     0   :  { %9 = vsyncpa [#allocation7], 0  ;;  %s581_s0 = inlined_call_operand.vmem [shape: f32[16,128], index: 0, kind: input, shape index: {}]   ;;  %s582_s1 = inlined_call_operand.hbm [shape: f32[128,128], index: 1, kind: input, shape index: {}]   ;;  %s583_s2 = inlined_call_operand.vmem [shape: s32[16,1], index: 2, kind: input, shape index: {}]   ;;  %s584_s3 = inlined_call_operand.vmem [shape: s32[1,128], index: 3, kind: input, shape index: {}]   ;;  %s585_s4 = inlined_call_operand.hbm [shape: f32[1,1,128], index: 4, kind: output, shape index: {}]  }
   0x1   :  { %10 = vsyncpa [#allocation8], 0  ;;  %s17_s17 = sshll.u32 %s582_s1, 4  ;;  %s489_s18 = smov [#allocation6]   ;;  %s18_s17 = int_to_ptr.hbm [resolvable:$true] %s17_s17 }
   0x2   :  { %s19_s19 = sshll.u32 %s489_s18, 4  ;;  %s490_s20 = smov 128   ;;  %s20_s19 = int_to_ptr.vmem [resolvable:$true] %s19_s19 }
   0x3   :  { %s491_s21 = smov 8  }
   0x4   :  { %25 = dma.hbm_to_vmem [thread:$0]  %s18_s17, 2048, %s20_s19, [#allocation7], %s490_s20, %s490_s20, %s491_s21  }
   0x5   :  { %485 = dma.done.wait [#allocation7], 2048  }
   0x6   :  { %486 = vsyncadd [#allocation7], 4294965248  ;;  %v64_v0 = vld [vmem:[#allocation6 + $0x78] sm:$0xff]  ;;  %v63_v1 = vld [vmem:[#allocation6 + $0x70] sm:$0xff]  ;;  %v492_v3 = vmov 0   ;;  %v102_v22 = vlaneseq  ;;  %v493_v29 = vmov 0.0  }
   0x7   :  { %65 = vmatpush.msra.mxu0 %v64_v0  ;;  %394 = vmatpush.msra.mxu1 %v64_v0  ;;  %v62_v2 = vld [vmem:[#allocation6 + $0x68] sm:$0xff]  ;;  %v61_v4 = vld [vmem:[#allocation6 + $0x60] sm:$0xff]  ;;  %v60_v5 = vld [vmem:[#allocation6 + $0x58] sm:$0xff]  ;;  %vm38_vm5 = vcmask 7168   ;;  %v494_v31 = vmov -1e+30  }
   0x8   :  { %418 = vset.pattern.permute.xlu2 %v492_v3  ;;  %417 = vset.pattern.permute.xlu1 %v492_v3  ;;  %v117_v6 = vld [vmem:[%s583_s2] sm:$0xff]  ;;  %v59_v7 = vld [vmem:[#allocation6 + $0x50] sm:$0xff]  ;;  %v58_v8 = vld [vmem:[#allocation6 + $0x48] sm:$0xff]  ;;  %v103_v23 = vshrl.u32 %v102_v22, 7  ;;  %v109_v24 = vand.u32 127, %v102_v22  ;;  %39 = vst.msk [vmem:[#allocation2] sm:$0xff] %vm38_vm5, %v494_v31 }
   0x9   :  { %66 = vmatpush.msra.mxu0 %v63_v1  ;;  %395 = vmatpush.msra.mxu1 %v63_v1  ;;  %v57_v9 = vld [vmem:[#allocation6 + $0x40] sm:$0xff]  ;;  %v118_v10 = vld [vmem:[%s583_s2 + $0x8] sm:$0xff]  ;;  %v56_v11 = vld [vmem:[#allocation6 + $0x38] sm:$0xff]  ;;  %40 = vst.msk [vmem:[#allocation2 + $0x8] sm:$0xff] %vm38_vm5, %v494_v31  ;;  %s380_s6 = sshll.u32 %s585_s4, 4  ;;  %s381_s6 = int_to_ptr.hbm [resolvable:$true] %s380_s6 }
   0xa   :  { %419 = vset.pattern.permute.xlu0 %v492_v3  ;;  %121 = vperm.xlu2 %418, %v117_v6   ;;  %v55_v12 = vld [vmem:[#allocation6 + $0x30] sm:$0xff]  ;;  %v54_v13 = vld [vmem:[#allocation6 + $0x28] sm:$0xff]  ;;  %v53_v14 = vld [vmem:[#allocation6 + $0x20] sm:$0xff]  ;;  %v104_v27 = vadd.s32 8, %v103_v23  ;;  %vm114_vm0 = vcmp.lt.s32.totalorder %v109_v24, 16  ;;  %41 = vst.msk [vmem:[#allocation3] sm:$0xff] %vm38_vm5, %v493_v29  ;;  %vm112_vm6 = vcmp.ne.s32.totalorder %v103_v23, %v109_v24 }
   0xb   :  { %67 = vmatpush.msra.mxu0 %v62_v2  ;;  %396 = vmatpush.msra.mxu1 %v62_v2  ;;  %v52_v15 = vld [vmem:[#allocation6 + $0x18] sm:$0xff]  ;;  %v51_v16 = vld [vmem:[#allocation6 + $0x10] sm:$0xff]  ;;  %v50_v17 = vld [vmem:[#allocation6 + $0x8] sm:$0xff]  ;;  %42 = vst.msk [vmem:[#allocation3 + $0x8] sm:$0xff] %vm38_vm5, %v493_v29 }
   0xc   :  { %v49_v18 = vld [vmem:[#allocation6] sm:$0xff]  ;;  %v48_v20 = vld [vmem:[%s581_s0 + $0x8] sm:$0xff]  ;;  %vm113_vm2 = vcmp.ne.s32.totalorder %v104_v27, %v109_v24  ;;  %43 = vst.msk [vmem:[#allocation4] sm:$0xff] %vm38_vm5, %v493_v29  ;;  %vm115_vm8 = vmand %vm112_vm6, %vm114_vm0 }
   0xd   :  { %68 = vmatpush.msra.mxu0 %v61_v4  ;;  %397 = vmatpush.msra.mxu1 %v61_v4  ;;  %v47_v19 = vld [vmem:[%s581_s0] sm:$0xff]  ;;  %vm540_vm3 = vmand %vm113_vm2, %vm114_vm0  ;;  %44 = vst.msk [vmem:[#allocation4 + $0x8] sm:$0xff] %vm38_vm5, %v493_v29  ;;  %s495_s0 = smov [#allocation9]  }
   0xe   :  { %v420_v25 = vld [vmem:[%s584_s3] ss:$0 sm:$0xff]  ;;  %45 = vst.msk [vmem:[#allocation5] sm:$0xff] %vm38_vm5, %v493_v29  ;;  %s378_s3 = sshll.u32 %s495_s0, 4  ;;  %s379_s3 = int_to_ptr.vmem [resolvable:$true] %s378_s3 }
   0xf   :  { %69 = vmatpush.msra.mxu0 %v60_v5  ;;  %398 = vmatpush.msra.mxu1 %v60_v5  ;;  %46 = vst.msk [vmem:[#allocation5 + $0x8] sm:$0xff] %vm38_vm5, %v493_v29  ;;  %v137_v40 = vld [vmem:[#allocation2] sm:$0xff] }
  0x10   :  { %v138_v44 = vld [vmem:[#allocation2 + $0x8] sm:$0xff] }
  0x11   :  { %70 = vmatpush.msra.mxu0 %v59_v7  ;;  %399 = vmatpush.msra.mxu1 %v59_v7  ;;  %v167_v3 = vld [vmem:[#allocation3] sm:$0xff] }
  0x12   :  { %124 = vperm.xlu2 %418, %v118_v10   ;;  %v168_v10 = vld [vmem:[#allocation3 + $0x8] sm:$0xff] }
  0x13   :  { %71 = vmatpush.msra.mxu0 %v58_v8  ;;  %400 = vmatpush.msra.mxu1 %v58_v8 }
  0x15   :  { %72 = vmatpush.msra.mxu0 %v57_v9  ;;  %401 = vmatpush.msra.mxu1 %v57_v9  ;;  %v194_v52 = vld [vmem:[#allocation5] sm:$0xff] }
  0x16   :  { %v195_v60 = vld [vmem:[#allocation5 + $0x8] sm:$0xff] }
  0x17   :  { %73 = vmatpush.msra.mxu0 %v56_v11  ;;  %402 = vmatpush.msra.mxu1 %v56_v11 }
  0x19   :  { %74 = vmatpush.msra.mxu0 %v55_v12  ;;  %403 = vmatpush.msra.mxu1 %v55_v12 }
  0x1b   :  { %75 = vmatpush.msra.mxu0 %v54_v13  ;;  %404 = vmatpush.msra.mxu1 %v54_v13 }
  0x1d   :  { %76 = vmatpush.msra.mxu0 %v53_v14  ;;  %405 = vmatpush.msra.mxu1 %v53_v14 }
  0x1f   :  { %77 = vmatpush.msra.mxu0 %v52_v15  ;;  %406 = vmatpush.msra.mxu1 %v52_v15 }
  0x21   :  { %78 = vmatpush.msra.mxu0 %v51_v16  ;;  %407 = vmatpush.msra.mxu1 %v51_v16 }
  0x23   :  { %79 = vmatpush.msra.mxu0 %v50_v17  ;;  %408 = vmatpush.msra.mxu1 %v50_v17 }
  0x25   :  { %80 = vmatpush.msra.mxu0 %v49_v18  ;;  %409 = vmatpush.msra.mxu1 %v49_v18 }
  0x26   :  { %81 = vmatmul.f32.vlgmr.msra.gmra.mxu0 %v47_v19  ;;  %84 = vmatmul.f32.vlgmr.msra.gmra.mxu1 %v48_v20  ;;  %v182_v19 = vld [vmem:[#allocation4] sm:$0xff] }
  0x64   :  { %v122_v21 = vpop.permute.xlu2 %121 }
  0x65   :  { %vm127_vm7 = vcmp.eq.s32.totalorder %v122_v21, %v420_v25 }
  0x66   :  { %vm129_vm9 = vmand %vm127_vm7, %vm115_vm8 }
  0x67   :  { %v390_v33 = vsel %vm129_vm9, 1.0, %v493_v29 }
  0x6c   :  { %v125_v26 = vpop.permute.xlu2 %124 }
  0x6d   :  { %vm128_vm1 = vcmp.eq.s32.totalorder %v125_v26, %v420_v25 }
  0x6e   :  { %vm130_vm4 = vmand %vm128_vm1, %vm540_vm3 }
  0x6f   :  { %v391_v30 = vsel %vm130_vm4, 1.0, %v493_v29  ;;  %v183_v29 = vld [vmem:[#allocation4 + $0x8] sm:$0xff] }
  0xa3   :  { %v82_v32 = vpop.f32.mrf.mxu0  ;;  %v85_v35 = vpop.f32.mrf.mxu1 }
  0xa4   :  { %v88_v34 = vmul.f32 14.285714, %v82_v32  ;;  %v89_v38 = vmul.f32 14.285714, %v85_v35 }
  0xa6   :  { %v135_v36 = vsel %vm115_vm8, %v88_v34, -inf  ;;  %v184_v37 = vmul.f32 %v390_v33, %v88_v34  ;;  %v136_v39 = vsel %vm540_vm3, %v89_v38, -inf  ;;  %v185_v59 = vmul.f32 %v391_v30, %v89_v38 }
  0xa7   :  { %139 = vmax.xlane.f32.xlu0 %v135_v36 }
  0xaf   :  { %141 = vmax.xlane.f32.xlu0 %v136_v39 }
  0xb7   :  { %196 = vadd.xlane.f32.xlu0 %v390_v33 }
 0x11a   :  { %v140_v41 = vpop.xlane.xlu0 %139 }
 0x11b   :  { %v143_v42 = vmax.f32 %v137_v40, %v140_v41 }
 0x11d   :  { %v145_v43 = vsub.f32 %v137_v40, %v143_v42  ;;  %180 = vst.msk [vmem:[#allocation2] sm:$0xff] %vm38_vm5, %v143_v42  ;;  %153 = vperm.xlu1 %417, %v143_v42  }
 0x11f   :  { %v147_v63 = vmul.f32 1.442695, %v145_v43 }
 0x122   :  { %v142_v45 = vpop.xlane.xlu0 %141 }
 0x123   :  { %v144_v46 = vmax.f32 %v138_v44, %v142_v45 }
 0x125   :  { %v146_v47 = vsub.f32 %v138_v44, %v144_v46  ;;  %181 = vst.msk [vmem:[#allocation2 + $0x8] sm:$0xff] %vm38_vm5, %v144_v46  ;;  %158 = vperm.xlu1 %417, %v144_v46  }
 0x127   :  { %v149_v0 = vmul.f32 1.442695, %v146_v47 }
 0x12a   :  { %v197_v51 = vpop.xlane.xlu0 %196 }
 0x12b   :  { %v200_v53 = vadd.f32 %v197_v51, %v194_v52 }
 0x12c   :  { %v294_v43 = vld [vmem:[#allocation2 + $0x8] sm:$0xff] }
 0x12d   :  { %202 = vst.msk [vmem:[#allocation5] sm:$0xff] %vm38_vm5, %v200_v53 }
 0x134   :  { %v303_v1 = vld [vmem:[#allocation5] sm:$0xff] }
 0x135   :  { %vm305_vm10 = vcmp.lt.f32.partialorder %v303_v1, 1e-06 }
 0x136   :  { %v307_v7 = vsel %vm305_vm10, 1.0, %v303_v1 }
 0x137   :  { %vm320_vm12 = vweird.f32 %v307_v7  ;;  %v326_v34 = vand.u32 2147483648, %v307_v7 }
 0x139   :  { %v327_v45 = vor.u32 1.1754944e-38, %v326_v34 }
 0x14f   :  { %198 = vadd.xlane.f32.xlu1 %v391_v30  ;;  %v293_v30 = vld [vmem:[#allocation2] sm:$0xff] }
 0x18f   :  { %v154_v48 = vpop.permute.xlu1 %153 }
 0x190   :  { %v161_v49 = vsub.f32 %v135_v36, %v154_v48 }
 0x192   :  { %v163_v50 = vmul.f32 1.442695, %v161_v49 }
 0x194   :  { %421 = vpow2.f32 %v163_v50 }
 0x197   :  { %v159_v54 = vpop.permute.xlu1 %158 }
 0x198   :  { %v162_v55 = vsub.f32 %v136_v39, %v159_v54  ;;  %v324_v39 = vand.u32 2147483647, %v307_v7 }
 0x19a   :  { %v422_v56 = vpop.eup %421  ;;  %v165_v57 = vmul.f32 1.442695, %v162_v55  ;;  %vm325_vm1 = vcmp.eq.f32.partialorder %v324_v39, 8.507059e+37 }
 0x19b   :  { %171 = vadd.xlane.f32.xlu2 %v422_v56 }
 0x19c   :  { %423 = vpow2.f32 %v165_v57 }
 0x19d   :  { %425 = vpow2.f32 %v147_v63 }
 0x19e   :  { %427 = vpow2.f32 %v149_v0 }
 0x19f   :  { %429 = vrcp.f32 %v307_v7 }
 0x1a2   :  { %v424_v58 = vpop.eup %423 }
 0x1a3   :  { %173 = vadd.xlane.f32.xlu0 %v424_v58  ;;  %v426_v2 = vpop.eup %425 }
 0x1a4   :  { %v169_v5 = vmul.f32 %v426_v2, %v167_v3  ;;  %v428_v9 = vpop.eup %427 }
 0x1a5   :  { %v170_v12 = vmul.f32 %v428_v9, %v168_v10  ;;  %v430_v14 = vpop.eup %429 }
 0x1a6   :  { %v316_v17 = vmul.f32 %v430_v14, %v307_v7  ;;  %vm321_vm13 = vweird.f32 %v430_v14 }
 0x1a7   :  { %vm568_vm14 = vmor %vm320_vm12, %vm321_vm13 }
 0x1a8   :  { %v317_v21 = vsub.f32 1.0, %v316_v17 }
 0x1aa   :  { %v318_v27 = vmul.f32 %v430_v14, %v317_v21 }
 0x1ab   :  { %186 = vadd.xlane.f32.xlu0 %v184_v37 }
 0x1ac   :  { %v319_v33 = vadd.f32 %v430_v14, %v318_v27 }
 0x1ae   :  { %v323_v44 = vsel %vm568_vm14, %v430_v14, %v319_v33 }
 0x1af   :  { %v328_v51 = vsel %vm325_vm1, %v327_v45, %v323_v44 }
 0x1b3   :  { %188 = vadd.xlane.f32.xlu0 %v185_v59 }
 0x1c2   :  { %v199_v61 = vpop.xlane.xlu1 %198 }
 0x1c3   :  { %v201_v62 = vadd.f32 %v199_v61, %v195_v60 }
 0x1c5   :  { %203 = vst.msk [vmem:[#allocation5 + $0x8] sm:$0xff] %vm38_vm5, %v201_v62 }
 0x1cc   :  { %v561_v4 = vld [vmem:[#allocation5 + $0x8] sm:$0xff] }
 0x1cd   :  { %vm306_vm11 = vcmp.lt.f32.partialorder %v561_v4, 1e-06 }
 0x1ce   :  { %v308_v11 = vsel %vm306_vm11, 1.0, %v561_v4 }
 0x1cf   :  { %431 = vrcp.f32 %v308_v11  ;;  %vm334_vm15 = vweird.f32 %v308_v11  ;;  %v340_v47 = vand.u32 2147483648, %v308_v11  ;;  %v338_v50 = vand.u32 2147483647, %v308_v11 }
 0x1d1   :  { %v341_v52 = vor.u32 1.1754944e-38, %v340_v47  ;;  %vm339_vm3 = vcmp.eq.f32.partialorder %v338_v50, 8.507059e+37 }
 0x1d5   :  { %v432_v18 = vpop.eup %431 }
 0x1d6   :  { %v330_v22 = vmul.f32 %v432_v18, %v308_v11  ;;  %vm335_vm0 = vweird.f32 %v432_v18 }
 0x1d7   :  { %vm336_vm2 = vmor %vm334_vm15, %vm335_vm0 }
 0x1d8   :  { %v331_v28 = vsub.f32 1.0, %v330_v22 }
 0x1da   :  { %v332_v35 = vmul.f32 %v432_v18, %v331_v28 }
 0x1dc   :  { %v333_v46 = vadd.f32 %v432_v18, %v332_v35 }
 0x1de   :  { %v337_v54 = vsel %vm336_vm2, %v432_v18, %v333_v46 }
 0x1df   :  { %v342_v58 = vsel %vm339_vm3, %v341_v52, %v337_v54 }
 0x20e   :  { %v172_v6 = vpop.xlane.xlu2 %171 }
 0x20f   :  { %v175_v8 = vadd.f32 %v172_v6, %v169_v5 }
 0x211   :  { %178 = vst.msk [vmem:[#allocation3] sm:$0xff] %vm38_vm5, %v175_v8 }
 0x216   :  { %v174_v13 = vpop.xlane.xlu0 %173 }
 0x217   :  { %v176_v15 = vadd.f32 %v174_v13, %v170_v12 }
 0x218   :  { %v295_v16 = vld [vmem:[#allocation3] sm:$0xff] }
 0x219   :  { %179 = vst.msk [vmem:[#allocation3 + $0x8] sm:$0xff] %vm38_vm5, %v176_v15  ;;  %433 = vlog2.f32 %v295_v16 }
 0x21e   :  { %v187_v20 = vpop.xlane.xlu0 %186 }
 0x21f   :  { %v434_v23 = vpop.eup %433  ;;  %v190_v24 = vadd.f32 %v187_v20, %v182_v19 }
 0x220   :  { %v296_v25 = vld [vmem:[#allocation3 + $0x8] sm:$0xff]  ;;  %v298_v26 = vmul.f32 0.6931472, %v434_v23 }
 0x221   :  { %192 = vst.msk [vmem:[#allocation4] sm:$0xff] %vm38_vm5, %v190_v24  ;;  %435 = vlog2.f32 %v296_v25 }
 0x222   :  { %v301_v31 = vadd.f32 %v298_v26, %v293_v30 }
 0x224   :  { %v311_v42 = vmul.f32 %v303_v1, %v301_v31 }
 0x226   :  { %v189_v32 = vpop.xlane.xlu0 %188 }
 0x227   :  { %v436_v36 = vpop.eup %435  ;;  %v191_v37 = vadd.f32 %v189_v32, %v183_v29 }
 0x228   :  { %v300_v40 = vmul.f32 0.6931472, %v436_v36  ;;  %v309_v41 = vld [vmem:[#allocation4] sm:$0xff] }
 0x229   :  { %193 = vst.msk [vmem:[#allocation4 + $0x8] sm:$0xff] %vm38_vm5, %v191_v37  ;;  %v313_v49 = vsub.f32 %v309_v41, %v311_v42 }
 0x22a   :  { %v302_v48 = vadd.f32 %v300_v40, %v294_v43 }
 0x22b   :  { %v343_v55 = vmul.f32 %v328_v51, %v313_v49 }
 0x22c   :  { %v312_v53 = vmul.f32 %v561_v4, %v302_v48 }
 0x22d   :  { %v345_v60 = vmul.f32 -1.0, %v343_v55 }
 0x22f   :  { %v358_v62 = vsel %vm38_vm5, %v345_v60, 0.0 }
 0x230   :  { %v310_v56 = vld [vmem:[#allocation4 + $0x8] sm:$0xff] }
 0x231   :  { %v314_v57 = vsub.f32 %v310_v56, %v312_v53 }
 0x233   :  { %v344_v59 = vmul.f32 %v342_v58, %v314_v57 }
 0x235   :  { %v346_v61 = vmul.f32 -1.0, %v344_v59 }
 0x237   :  { %v359_v63 = vsel %vm38_vm5, %v346_v61, 0.0 }
 0x238   :  { %v360_v0 = vadd.f32 %v359_v63, %v358_v62 }
 0x23a   :  { %v361_v1 = vrot.slane %v360_v0, 4 }
 0x23c   :  { %v362_v2 = vadd.f32 %v361_v1, %v360_v0 }
 0x23e   :  { %v363_v3 = vrot.slane %v362_v2, 2 }
 0x240   :  { %v364_v5 = vadd.f32 %v363_v3, %v362_v2 }
 0x242   :  { %v365_v6 = vrot.slane %v364_v5, 1 }
 0x244   :  { %v366_v4 = vadd.f32 %v365_v6, %v364_v5 }
 0x246   :  { %369 = vperm.xlu0 %419, %v366_v4  }
 0x2b8   :  { %v370_v7 = vpop.permute.xlu0 %369 }
 0x2b9   :  { %372 = vst [vmem:[#allocation9] sm:$0x1] %v370_v7 }
 0x2ba   :  { %383 = dma.vmem_to_hbm [thread:$0]  %s379_s3, 16, %s381_s6, [#allocation8]  }
 0x2bb   :  { %487 = dma.done.wait [#allocation8], 16  }
 0x2bc   :  { %488 = vsyncadd [#allocation8], 4294967280 }
 0x2bd   :  { %388 = vsyncpa [#allocation7], 1 }
 0x2be   :  { %389 = vsyncpa [#allocation8], 1 }

</bundles_post_ra>
